<compile_context>
chip_gen: v7x
topology: tpu7x:2x2x1
jax: 0.10.0
libtpu: 0.0.40
codegen_flags: <defaults>
</compile_context>

<pallas_src>
import jax
import jax.numpy as jnp
from jax.experimental import pallas as pl
from jax.experimental.pallas import tpu as pltpu


def _round_up(x, m):
    return (x + m - 1) // m * m


def masked_mean_kernel(x_ref, m_ref, o_ref):
    """x_ref: (T, bt, dn) state tile; m_ref: (T, bt, 1) live mask; o_ref: (bt, dn)."""
    x = x_ref[...]                              # (T, bt, dn)
    m = m_ref[...]                              # (T, bt, 1), broadcast over lanes
    s = jnp.sum(x * m, axis=0)                  # (bt, dn)  masked sum over time
    cnt = jnp.sum(m, axis=0)                    # (bt, 1)   live-step count
    denom = jnp.where(cnt > 0.0, cnt, 1.0)      # padded batch rows: cnt == 0 -> 0 output
    o_ref[...] = (s / denom).astype(o_ref.dtype)


def masked_mean_pallas(state_cube, live_mat):
    """state_cube: (T, B, D) f32, live_mat: (T, B) f32 -> (B, D) masked mean over T."""
    T, B, D = state_cube.shape
    Bp = _round_up(B, 8)              # sublane-pad batch (f32 sublane = 8)
    Dp = _round_up(D, 128)            # lane-pad features -> lane-dense output stores

    # Feature tile: whole Dp if small, else 512-lane chunks (128 always divides Dp).
    dn = Dp if Dp <= 512 else (512 if Dp % 512 == 0 else 128)
    # Batch tile: whole Bp if the (T, bt, dn) input buffer stays comfortably
    # inside VMEM (Pallas double-buffers it); otherwise fall back to 8 rows.
    bytes_per_row = T * dn * 4
    bt_cap = max(8, ((4 << 20) // max(bytes_per_row, 1)) // 8 * 8)
    bt = Bp if Bp <= bt_cap else 8

    x_p = jnp.zeros((T, Bp, Dp), jnp.float32).at[:, :B, :D].set(state_cube)
    m_p = jnp.zeros((T, Bp, 1), jnp.float32).at[:, :B, 0].set(live_mat)

    out_p = pl.pallas_call(
        masked_mean_kernel,
        out_shape=jax.ShapeDtypeStruct((Bp, Dp), jnp.float32),
        grid=(Bp // bt, Dp // dn),
        in_specs=[
            pl.BlockSpec((T, bt, dn), lambda b, d: (0, b, d)),   # state tile
            pl.BlockSpec((T, bt, 1), lambda b, d: (0, b, 0)),    # live mask tile
        ],
        out_specs=pl.BlockSpec((bt, dn), lambda b, d: (b, d)),
        compiler_params=pltpu.CompilerParams(
            dimension_semantics=("parallel", "parallel")),       # tiles shard across TCs
    )(x_p, m_p)
    return out_p[:B, :D]


def state_tracker_avg2_forward(item_ids, rewards, live_mat, emb_table,
                               r_min=0.0, r_max=5.0, reward_handle="cat"):
    """Mirrors StateTrackerAvg2.forward (is_train path, use_userEmbedding=False)."""
    # --- glue: get_embedding('action') == embedding lookup of item ids ---
    e_i = jnp.take(emb_table, item_ids, axis=0)               # (T*B, dim_model)
    # get_embedding('feedback') on the dense reward column == the reward value
    e_r = rewards.reshape(-1, 1).astype(jnp.float32)          # (T*B, 1)

    if (r_max is not None) and (r_min is not None):
        normed_r = (e_r - r_min) / (r_max - r_min)
        normed_r = jnp.minimum(normed_r, 1.0)                  # normed_r[normed_r > 1] = 1
    else:
        normed_r = e_r

    s_t = e_i
    if reward_handle == "mul":
        state_flat = s_t * normed_r
    elif reward_handle == "cat":
        state_flat = jnp.concatenate([s_t, normed_r], axis=1)
    elif reward_handle == "cat2":
        state_flat = jnp.concatenate([s_t, e_r], axis=1)
    else:
        state_flat = s_t

    T, B = live_mat.shape
    state_cube = state_flat.reshape(T, B, state_flat.shape[-1])   # (T, B, D)

    # --- hot path in Pallas: masking + sum over T + divide by live count ---
    return masked_mean_pallas(state_cube, live_mat.astype(jnp.float32))


if __name__ == "__main__":
    key = jax.random.PRNGKey(0)
    keys = jax.random.split(key, 4)

    # Small shapes consistent with the module
    num_item = 100          # embedding rows (plus 1 padding row == self.num_item)
    dim_model = 32          # dim_item
    window = 8              # window_size -> sequence length T
    batch = 2               # len(index)
    D = dim_model + 1       # reward_handle='cat' appends the normalized reward column

    # item embedding table (feat_item.weight cat'd with one extra padding row)
    emb_table = 0.01 * jax.random.normal(keys[0], (num_item + 1, dim_model), jnp.float32)

    # Synthetic outputs of the host-side buffer walk: item ids, rewards, live mask
    item_ids = jax.random.randint(keys[1], (window * batch,), 0, num_item + 1)
    rewards = jax.random.uniform(keys[2], (window * batch,), jnp.float32, 0.0, 5.0)
    live = (jax.random.uniform(keys[3], (window, batch)) > 0.2).astype(jnp.float32)
    # reference guarantees every column has at least one live step
    live_mat = live.at[0, :].set(1.0)

    state_final = state_tracker_avg2_forward(
        item_ids, rewards, live_mat, emb_table,
        r_min=0.0, r_max=5.0, reward_handle="cat")
    state_final = jax.block_until_ready(state_final)

    # Pure-JAX reference of the same forward pass
    e_i = jnp.take(emb_table, item_ids, axis=0)
    e_r = rewards.reshape(-1, 1)
    normed_r = jnp.minimum((e_r - 0.0) / (5.0 - 0.0), 1.0)
    state_flat = jnp.concatenate([e_i, normed_r], axis=1)
    state_cube = state_flat.reshape(window, batch, D)
    ref = (state_cube * live_mat[..., None]).sum(0) / live_mat.sum(0)[:, None]

    assert state_final.shape == (batch, D)
    assert bool(jnp.all(jnp.isfinite(state_final)))
    assert bool(jnp.allclose(state_final, ref, atol=1e-5, rtol=1e-5))
    print("KERNEL_OK")
</pallas_src>

<mosaic_0001>
module attributes {stable_mosaic.version = 11 : i64} {
  func.func @masked_mean_kernel(%arg0: i32, %arg1: i32, %arg2: memref<8x8x128xf32, #tpu.memory_space<vmem>>, %arg3: memref<8x8x1xf32, #tpu.memory_space<vmem>>, %arg4: memref<8x128xf32, #tpu.memory_space<vmem>>) attributes {dimension_semantics = [#tpu.dimension_semantics<parallel>, #tpu.dimension_semantics<parallel>], iteration_bounds = array<i64: 1, 1>, scalar_prefetch = 0 : i64, scratch_operands = 0 : i64, tpu.core_type = #tpu.core_type<tc>, window_params = [{transform_indices = @transform_0, window_bounds = array<i64: 8, 8, 128>}, {transform_indices = @transform_1, window_bounds = array<i64: 8, 8, 1>}, {transform_indices = @transform_2, window_bounds = array<i64: 8, 128>}]} {
    %c0 = arith.constant 0 : index
    %c0_0 = arith.constant 0 : index
    %c0_1 = arith.constant 0 : index
    %0 = vector.load %arg2[%c0, %c0_0, %c0_1] : memref<8x8x128xf32, #tpu.memory_space<vmem>>, vector<8x8x128xf32>
    %c0_2 = arith.constant 0 : index
    %c0_3 = arith.constant 0 : index
    %c0_4 = arith.constant 0 : index
    %1 = vector.load %arg3[%c0_2, %c0_3, %c0_4] : memref<8x8x1xf32, #tpu.memory_space<vmem>>, vector<8x8x1xf32>
    %2 = vector.broadcast %1 : vector<8x8x1xf32> to vector<8x8x128xf32>
    %3 = arith.mulf %0, %2 : vector<8x8x128xf32>
    %cst = arith.constant dense<0.000000e+00> : vector<8x128xf32>
    %4 = vector.multi_reduction <add>, %3, %cst [0] : vector<8x8x128xf32> to vector<8x128xf32>
    %cst_5 = arith.constant dense<0.000000e+00> : vector<8x1xf32>
    %5 = vector.multi_reduction <add>, %1, %cst_5 [0] : vector<8x8x1xf32> to vector<8x1xf32>
    %cst_6 = arith.constant 0.000000e+00 : f32
    %6 = vector.broadcast %cst_6 : f32 to vector<8x1xf32>
    %7 = arith.cmpf ogt, %5, %6 : vector<8x1xf32>
    %cst_7 = arith.constant 1.000000e+00 : f32
    %8 = vector.broadcast %cst_7 : f32 to vector<8x1xf32>
    %9 = arith.select %7, %5, %8 : vector<8x1xi1>, vector<8x1xf32>
    %10 = vector.broadcast %9 : vector<8x1xf32> to vector<8x128xf32>
    %11 = arith.divf %4, %10 : vector<8x128xf32>
    %c0_8 = arith.constant 0 : index
    %c0_9 = arith.constant 0 : index
    %12 = vector.load %arg4[%c0_8, %c0_9] : memref<8x128xf32, #tpu.memory_space<vmem>>, vector<8x128xf32>
    tpu.vector_store %arg4[%c0_8, %c0_9], %11 {strides = array<i32>} : memref<8x128xf32, #tpu.memory_space<vmem>>, vector<8x128xf32>,
    return
  }
  func.func @transform_0(%arg0: i32, %arg1: i32) -> (i32, i32, i32) {
    %c0_i32 = arith.constant 0 : i32
    %c0_i32_0 = arith.constant 0 : i32
    return %c0_i32, %arg0, %arg1 : i32, i32, i32
  }
  func.func @transform_1(%arg0: i32, %arg1: i32) -> (i32, i32, i32) {
    %c0_i32 = arith.constant 0 : i32
    %c0_i32_0 = arith.constant 0 : i32
    %c0_i32_1 = arith.constant 0 : i32
    return %c0_i32, %arg0, %c0_i32_0 : i32, i32, i32
  }
  func.func @transform_2(%arg0: i32, %arg1: i32) -> (i32, i32) {
    %c0_i32 = arith.constant 0 : i32
    return %arg0, %arg1 : i32, i32
  }
}

</mosaic_0001>

<bundles_post_ra>
// kernel: tpu_custom_call.1
= control target key start
LH: loop header
LB: loop body
LE: loop exit
PB: predicated region body
PF: predicated region fallthrough
CT: control target
= control target key end

     0   :  { %vm83_vm0 = vcmask 7168   ;;  %v153_v2 = vmov 0   ;;  %s238_s0 = inlined_call_operand.vmem [shape: f32[8,8,128], index: 0, kind: input, shape index: {}]   ;;  %s239_s1 = inlined_call_operand.vmem [shape: f32[8,8,1], index: 1, kind: input, shape index: {}]   ;;  %s240_s2 = inlined_call_operand.hbm [shape: f32[8,128], index: 2, kind: output, shape index: {}]  }
   0x1   :  { %v22_v0 = vld [vmem:[%s239_s1 + $0x10] sm:$0xff]  ;;  %v20_v1 = vld [vmem:[%s239_s1] sm:$0xff]  ;;  %126 = vset.pattern.permute.xlu1 %v153_v2  ;;  %125 = vset.pattern.permute.xlu0 %v153_v2  ;;  %v23_v4 = vld [vmem:[%s239_s1 + $0x18] sm:$0xff] }
   0x2   :  { %v84_v3 = vsel %vm83_vm0, %v20_v1, 0.0  ;;  %v21_v5 = vld [vmem:[%s239_s1 + $0x8] sm:$0xff]  ;;  %40 = vperm.xlu1 %126, %v22_v0   ;;  %v87_v6 = vsel %vm83_vm0, %v22_v0, 0.0  ;;  %30 = vperm.xlu0 %125, %v20_v1   ;;  %v24_v9 = vld [vmem:[%s239_s1 + $0x20] sm:$0xff] }
   0x3   :  { %v85_v7 = vsel %vm83_vm0, %v21_v5, 0.0 }
   0x4   :  { %v86_v8 = vadd.f32 %v85_v7, %v84_v3 }
   0x5   :  { %7 = vsyncpa [#allocation3], 0  ;;  %v89_v10 = vsel %vm83_vm0, %v23_v4, 0.0  ;;  %v25_v12 = vld [vmem:[%s239_s1 + $0x28] sm:$0xff]  ;;  %v91_v13 = vsel %vm83_vm0, %v24_v9, 0.0  ;;  %v26_v15 = vld [vmem:[%s239_s1 + $0x30] sm:$0xff] }
   0x6   :  { %v88_v11 = vadd.f32 %v87_v6, %v86_v8  ;;  %45 = vperm.xlu1 %126, %v23_v4   ;;  %35 = vperm.xlu0 %125, %v21_v5   ;;  %v93_v16 = vsel %vm83_vm0, %v25_v12, 0.0  ;;  %v27_v18 = vld [vmem:[%s239_s1 + $0x38] sm:$0xff]  ;;  %v95_v19 = vsel %vm83_vm0, %v26_v15, 0.0  ;;  %v12_v27 = vld [vmem:[%s238_s0] sm:$0xff]  ;;  %v13_v28 = vld [vmem:[%s238_s0 + $0x8] sm:$0xff]  ;;  %s154_s12 = smov [#allocation2]  }
   0x7   :  { %v97_v21 = vsel %vm83_vm0, %v27_v18, 0.0  ;;  %v14_v32 = vld [vmem:[%s238_s0 + $0x10] sm:$0xff]  ;;  %v15_v36 = vld [vmem:[%s238_s0 + $0x18] sm:$0xff]  ;;  %v16_v40 = vld [vmem:[%s238_s0 + $0x20] sm:$0xff]  ;;  %s115_s13 = sshll.u32 %s154_s12, 4  ;;  %s116_s13 = int_to_ptr.vmem [resolvable:$true] %s115_s13 }
   0x8   :  { %v90_v14 = vadd.f32 %v89_v10, %v88_v11  ;;  %v17_v44 = vld [vmem:[%s238_s0 + $0x28] sm:$0xff]  ;;  %v18_v46 = vld [vmem:[%s238_s0 + $0x30] sm:$0xff]  ;;  %v19_v50 = vld [vmem:[%s238_s0 + $0x38] sm:$0xff]  ;;  %s129_s14 = scalar_lea.vmem %s116_s13, 128  ;;  %p134_p1 = scmp.lt.s32.totalorder %s116_s13, %s116_s13 }
   0x9   :  { %p130_p0 = scmp.ne.s32.totalorder %s116_s13, %s129_s14  ;;  %p135_p2 = scmp.lt.s32.totalorder %s129_s14, %s129_s14 }
   0xa   :  { %v92_v17 = vadd.f32 %v91_v13, %v90_v14  ;;  %50 = vperm.xlu1 %126, %v24_v9  }
   0xb   :  { %p136_p3 = por %p135_p2, %p134_p1 }
   0xc   :  { %v94_v20 = vadd.f32 %v93_v16, %v92_v17 }
   0xd   :  { %p137_p4 = pnand %p136_p3, %p130_p0 }
   0xe   :  { %v96_v22 = vadd.f32 %v95_v19, %v94_v20  ;;  %60 = vperm.xlu1 %126, %v26_v15  }
  0x10   :  { %v98_v23 = vadd.f32 %v97_v21, %v96_v22 }
  0x12   :  { %vm99_vm1 = vcmp.gt.f32.partialorder %v98_v23, 0.0 }
  0x13   :  { %v100_v24 = vsel %vm99_vm1, %v98_v23, 1.0 }
  0x14   :  { %103 = vperm.xlu0 %125, %v100_v24  }
  0x18   :  { %55 = vperm.xlu0 %125, %v25_v12  }
  0x1c   :  { %65 = vperm.xlu0 %125, %v27_v18  }
  0x81   :  { %v31_v25 = vpop.permute.xlu0 %30  ;;  %v41_v26 = vpop.permute.xlu1 %40 }
  0x82   :  { %v68_v30 = vmul.f32 %v31_v25, %v12_v27  ;;  %v70_v34 = vmul.f32 %v41_v26, %v14_v32 }
  0x85   :  { %v36_v29 = vpop.permute.xlu0 %35  ;;  %v46_v33 = vpop.permute.xlu1 %45 }
  0x86   :  { %v69_v31 = vmul.f32 %v36_v29, %v13_v28  ;;  %v71_v37 = vmul.f32 %v46_v33, %v15_v36 }
  0x88   :  { %v76_v35 = vadd.f32 %v69_v31, %v68_v30 }
  0x89   :  { %v51_v39 = vpop.permute.xlu1 %50 }
  0x8a   :  { %v77_v38 = vadd.f32 %v76_v35, %v70_v34  ;;  %v72_v42 = vmul.f32 %v51_v39, %v16_v40 }
  0x8c   :  { %v78_v43 = vadd.f32 %v77_v38, %v71_v37 }
  0x8d   :  { %v61_v45 = vpop.permute.xlu1 %60 }
  0x8e   :  { %v79_v48 = vadd.f32 %v78_v43, %v72_v42  ;;  %v74_v51 = vmul.f32 %v61_v45, %v18_v46 }
  0x93   :  { %v104_v41 = vpop.permute.xlu0 %103 }
  0x94   :  { %127 = vrcp.f32 %v104_v41 }
  0x97   :  { %v56_v47 = vpop.permute.xlu0 %55 }
  0x98   :  { %v73_v49 = vmul.f32 %v56_v47, %v17_v44 }
  0x9a   :  { %v80_v52 = vadd.f32 %v79_v48, %v73_v49 }
  0x9b   :  { %v66_v53 = vpop.permute.xlu0 %65 }
  0x9c   :  { %v75_v54 = vmul.f32 %v66_v53, %v19_v50  ;;  %v81_v55 = vadd.f32 %v80_v52, %v74_v51 }
  0x9e   :  { %v128_v56 = vpop.eup %127  ;;  %v82_v57 = vadd.f32 %v81_v55, %v75_v54 }
  0xa0   :  { %v107_v58 = vmul.f32 %v128_v56, %v82_v57 }
  0xa2   :  { %108 = vst [vmem:[#allocation2] sm:$0xff] %v107_v58 }
  0xa3   :  { %140 = shalt.err (!%p137_p4)
}
  0xa4   :  { %s141_s16 = scalar_lea.hbm %s240_s2, 128 }
  0xa5   :  { %p142_p5 = scmp.ne.s32.totalorder %s240_s2, %s141_s16  ;;  %p145_p6 = scmp.lt.u32.totalorder %s141_s16, %s240_s2 }
  0xa7   :  { %p147_p7 = pnand %p145_p6, %p142_p5 }
  0xa9   :  { %150 = shalt.err (!%p147_p7)
}
  0xaa   :  { %118 = dma.vmem_to_hbm [thread:$0]  %s116_s13, 128, %s240_s2, [#allocation3]  }
  0xab   :  { %151 = dma.done.wait [#allocation3], 128  }
  0xac   :  { %152 = vsyncadd [#allocation3], 4294967168 }
  0xad   :  { %122 = vsyncpa [#allocation3], 1 }

</bundles_post_ra>
